<compile_context>
chip_gen: v7x
topology: tpu7x:2x2x1
jax: 0.10.0
libtpu: 0.0.40
codegen_flags: <defaults>
</compile_context>

<pallas_src>
import functools

import jax
import jax.numpy as jnp
from jax.experimental import pallas as pl
from jax.experimental.pallas import tpu as pltpu


def _focal_kl_kernel(logp_ref, q_ref, out_ref, *, gamma, eps):
    """One batch tile: (block_b, C_pad) inputs -> (8, C_pad) partial sums."""
    logp = logp_ref[...].astype(jnp.float32)          # (block_b, C_pad)
    q = q_ref[...].astype(jnp.float32)                # (block_b, C_pad)

    # q renormalization: q / (sum + eps) as multiply-by-reciprocal.
    row_sum = jnp.sum(q, axis=1, keepdims=True)       # (block_b, 1)
    qn = q * pl.reciprocal(row_sum + eps, approx=False)

    p = jnp.exp(logp)
    kl_el = qn * (jnp.log(qn + eps) - logp)

    base = 1.0 - p
    g_int = int(gamma)
    if float(gamma) == float(g_int) and 0 <= g_int <= 4:
        # Integer gamma (default 2): repeated multiply on the VPU. Matches
        # torch pow semantics for slightly-negative bases and keeps the EUP
        # slot free for exp/log.
        if g_int == 0:
            weights = jnp.ones_like(base)
        else:
            weights = base
            for _ in range(g_int - 1):
                weights = weights * base
    else:
        # Non-integer gamma: clamp base at 0 to avoid NaN when exp(logp)
        # rounds above 1 (pow lowers to exp(gamma*log(x))).
        weights = jnp.power(jnp.maximum(base, 0.0), gamma)

    loss_el = weights * kl_el                         # (block_b, C_pad)

    # Reduce only over vreg-granular row groups (pure VPU vreg adds, no XLU):
    # (block_b, C_pad) -> (block_b//8, 8, C_pad) -> (8, C_pad).
    block_b, c_pad = loss_el.shape
    out_ref[...] = jnp.sum(loss_el.reshape(block_b // 8, 8, c_pad), axis=0)


def focal_kl_loss(log_p, q, *, gamma=2.0, eps=1e-8, reduction="mean",
                  block_b=None):
    """Pallas implementation of FocalKLLoss.forward.

    log_p: (B, C) log-probabilities
    q:     (B, C) raw (unnormalized) label distributions
    Returns a scalar (float32).
    """
    B, C = log_p.shape
    assert q.shape == (B, C)
    assert reduction in ("mean", "sum")

    in_itemsize = max(jnp.dtype(log_p.dtype).itemsize,
                      jnp.dtype(q.dtype).itemsize)

    # Lane-dense class axis (multiple of 128).
    C_pad = ((C + 127) // 128) * 128
    # Sublane granularity: 8 rows for f32 inputs, 16 for bf16, 32 for int8.
    row_mult = max(8, 32 // in_itemsize)

    if block_b is None:
        # 2 inputs x 2 pipeline buffers of (block_b, C_pad) must fit the
        # input-buffer budget; cap rows so f32 temporaries stay small too.
        input_buf_budget = 8 << 20                    # 8 MiB for input DMA bufs
        rows = input_buf_budget // (4 * C_pad * in_itemsize)
        rows = min(rows, 2048)
        b_ceil = ((B + row_mult - 1) // row_mult) * row_mult
        rows = min(rows, b_ceil)                      # don't exceed padded batch
        block_b = max(row_mult, (rows // row_mult) * row_mult)
    assert block_b % row_mult == 0 and block_b >= 8

    num_tiles = pl.cdiv(B, block_b)
    B_pad = num_tiles * block_b

    # Zero padding contributes exactly zero loss:
    #   padded columns: q == 0 -> qn == 0 -> kl_el == 0 (row sums unchanged)
    #   padded rows:    q == 0 -> qn == 0 -> kl_el == 0
    if B_pad != B or C_pad != C:
        log_p = jnp.pad(log_p, ((0, B_pad - B), (0, C_pad - C)))
        q = jnp.pad(q, ((0, B_pad - B), (0, C_pad - C)))

    kernel = functools.partial(_focal_kl_kernel, gamma=gamma, eps=eps)

    # Rough VMEM need: input double buffers + f32 temporaries + margin,
    # clamped under v7x's 64 MiB physical VMEM.
    vmem_bytes = (4 * block_b * C_pad * in_itemsize
                  + 8 * block_b * C_pad * 4
                  + (4 << 20))
    vmem_bytes = int(min(max(vmem_bytes, 16 << 20), 48 << 20))

    partials = pl.pallas_call(
        kernel,
        out_shape=jax.ShapeDtypeStruct((num_tiles * 8, C_pad), jnp.float32),
        grid_spec=pltpu.PrefetchScalarGridSpec(
            num_scalar_prefetch=0,
            grid=(num_tiles,),
            in_specs=[
                pl.BlockSpec((block_b, C_pad), lambda i: (i, 0)),
                pl.BlockSpec((block_b, C_pad), lambda i: (i, 0)),
            ],
            out_specs=pl.BlockSpec((8, C_pad), lambda i: (i, 0)),
        ),
        compiler_params=pltpu.CompilerParams(
            dimension_semantics=("parallel",),  # independent tiles -> megacore ok
            vmem_limit_bytes=vmem_bytes,
        ),
    )(log_p, q)

    total = jnp.sum(partials)
    if reduction == "mean":
        return total / jnp.float32(B)
    return total


def focal_kl_loss_ref(log_p, q, *, gamma=2.0, eps=1e-8, reduction="mean"):
    """Pure-JAX reference matching the PyTorch module exactly."""
    q = q / (jnp.sum(q, axis=1, keepdims=True) + eps)
    p = jnp.exp(log_p)
    kl_el = q * (jnp.log(q + eps) - log_p)
    weights = jnp.power(1.0 - p, gamma)
    loss_el = weights * kl_el
    loss_per_sample = jnp.sum(loss_el, axis=1)
    if reduction == "mean":
        return jnp.mean(loss_per_sample)
    return jnp.sum(loss_per_sample)


if __name__ == "__main__":
    key = jax.random.PRNGKey(0)
    k1, k2 = jax.random.split(key)

    B, C = 16, 32  # small shapes consistent with a (B, C) classification head

    logits = jax.random.normal(k1, (B, C), dtype=jnp.float32)
    log_p = jax.nn.log_softmax(logits, axis=-1)          # log-probabilities
    q = jax.random.uniform(k2, (B, C), dtype=jnp.float32,
                           minval=0.0, maxval=1.0)       # raw label distributions

    loss = focal_kl_loss(log_p, q, gamma=2.0, eps=1e-8, reduction="mean")
    loss = jax.block_until_ready(loss)
    ref = focal_kl_loss_ref(log_p, q, gamma=2.0, eps=1e-8, reduction="mean")
    assert jnp.allclose(loss, ref, rtol=1e-4, atol=1e-6), (loss, ref)

    # Also exercise "sum" reduction and a ragged batch (B not a tile multiple).
    loss_sum = focal_kl_loss(log_p[:13], q[:13], reduction="sum")
    loss_sum = jax.block_until_ready(loss_sum)
    ref_sum = focal_kl_loss_ref(log_p[:13], q[:13], reduction="sum")
    assert jnp.allclose(loss_sum, ref_sum, rtol=1e-4, atol=1e-6), (loss_sum, ref_sum)

    print("KERNEL_OK")
</pallas_src>

<mosaic_0001>
module attributes {stable_mosaic.version = 11 : i64} {
  func.func @_focal_kl_kernel(%arg0: i32, %arg1: memref<16x128xf32, #tpu.memory_space<vmem>>, %arg2: memref<16x128xf32, #tpu.memory_space<vmem>>, %arg3: memref<8x128xf32, #tpu.memory_space<vmem>>) attributes {dimension_semantics = [#tpu.dimension_semantics<parallel>], iteration_bounds = array<i64: 1>, scalar_prefetch = 0 : i64, scratch_operands = 0 : i64, tpu.core_type = #tpu.core_type<tc>, window_params = [{transform_indices = @transform_0, window_bounds = array<i64: 16, 128>}, {transform_indices = @transform_1, window_bounds = array<i64: 16, 128>}, {transform_indices = @transform_2, window_bounds = array<i64: 8, 128>}]} {
    %c0 = arith.constant 0 : index
    %c0_0 = arith.constant 0 : index
    %0 = vector.load %arg1[%c0, %c0_0] : memref<16x128xf32, #tpu.memory_space<vmem>>, vector<16x128xf32>
    %c0_1 = arith.constant 0 : index
    %c0_2 = arith.constant 0 : index
    %1 = vector.load %arg2[%c0_1, %c0_2] : memref<16x128xf32, #tpu.memory_space<vmem>>, vector<16x128xf32>
    %cst = arith.constant dense<0.000000e+00> : vector<16xf32>
    %2 = vector.multi_reduction <add>, %1, %cst [1] : vector<16x128xf32> to vector<16xf32>
    %3 = vector.shape_cast %2 : vector<16xf32> to vector<16x1xf32>
    %cst_3 = arith.constant 9.99999993E-9 : f32
    %4 = vector.broadcast %cst_3 : f32 to vector<16x1xf32>
    %5 = arith.addf %3, %4 : vector<16x1xf32>
    %6 = tpu.reciprocal %5 : vector<16x1xf32> -> vector<16x1xf32>
    %7 = vector.broadcast %6 : vector<16x1xf32> to vector<16x128xf32>
    %8 = arith.mulf %1, %7 : vector<16x128xf32>
    %9 = math.exp %0 : vector<16x128xf32>
    %cst_4 = arith.constant 9.99999993E-9 : f32
    %10 = vector.broadcast %cst_4 : f32 to vector<16x128xf32>
    %11 = arith.addf %8, %10 : vector<16x128xf32>
    %12 = math.log %11 : vector<16x128xf32>
    %13 = arith.subf %12, %0 : vector<16x128xf32>
    %14 = arith.mulf %8, %13 : vector<16x128xf32>
    %cst_5 = arith.constant 1.000000e+00 : f32
    %15 = vector.broadcast %cst_5 : f32 to vector<16x128xf32>
    %16 = arith.subf %15, %9 : vector<16x128xf32>
    %17 = arith.mulf %16, %16 : vector<16x128xf32>
    %18 = arith.mulf %17, %14 : vector<16x128xf32>
    %19 = vector.shape_cast %18 : vector<16x128xf32> to vector<2x8x128xf32>
    %cst_6 = arith.constant dense<0.000000e+00> : vector<8x128xf32>
    %20 = vector.multi_reduction <add>, %19, %cst_6 [0] : vector<2x8x128xf32> to vector<8x128xf32>
    %c0_7 = arith.constant 0 : index
    %c0_8 = arith.constant 0 : index
    %21 = vector.load %arg3[%c0_7, %c0_8] : memref<8x128xf32, #tpu.memory_space<vmem>>, vector<8x128xf32>
    tpu.vector_store %arg3[%c0_7, %c0_8], %20 {strides = array<i32>} : memref<8x128xf32, #tpu.memory_space<vmem>>, vector<8x128xf32>,
    return
  }
  func.func @transform_0(%arg0: i32) -> (i32, i32) {
    %c0_i32 = arith.constant 0 : i32
    %c0_i32_0 = arith.constant 0 : i32
    return %arg0, %c0_i32 : i32, i32
  }
  func.func @transform_1(%arg0: i32) -> (i32, i32) {
    %c0_i32 = arith.constant 0 : i32
    %c0_i32_0 = arith.constant 0 : i32
    return %arg0, %c0_i32 : i32, i32
  }
  func.func @transform_2(%arg0: i32) -> (i32, i32) {
    %c0_i32 = arith.constant 0 : i32
    %c0_i32_0 = arith.constant 0 : i32
    return %arg0, %c0_i32 : i32, i32
  }
}

</mosaic_0001>

<bundles_post_ra>
// kernel: tpu_custom_call.1
= control target key start
LH: loop header
LB: loop body
LE: loop exit
PB: predicated region body
PF: predicated region fallthrough
CT: control target
= control target key end

     0   :  { %7 = vsyncpa [#allocation3], 0  ;;  %s237_s0 = inlined_call_operand.hbm [shape: f32[16,128], index: 0, kind: input, shape index: {}]   ;;  %s238_s1 = inlined_call_operand.hbm [shape: f32[16,128], index: 1, kind: input, shape index: {}]   ;;  %s239_s2 = inlined_call_operand.hbm [shape: f32[8,128], index: 2, kind: output, shape index: {}]  }
   0x1   :  { %8 = vsyncpa [#allocation6], 0 }
   0x2   :  { %9 = vsyncpa [#allocation4], 0  ;;  %s181_s9 = smov [#allocation2]   ;;  %s109_s13 = scalar_lea.hbm %s237_s0, 256 }
   0x3   :  { %s15_s10 = sshll.u32 %s181_s9, 4  ;;  %p110_p0 = scmp.ne.s32.totalorder %s237_s0, %s109_s13  ;;  %s16_s10 = int_to_ptr.vmem [resolvable:$true] %s15_s10 }
   0x4   :  { %p113_p1 = scmp.lt.u32.totalorder %s109_s13, %s237_s0 }
   0x6   :  { %p115_p2 = pnand %p113_p1, %p110_p0 }
   0x8   :  { %118 = shalt.err (!%p115_p2)
}
   0x9   :  { %s119_s18 = scalar_lea.vmem %s16_s10, 256  ;;  %p124_p4 = scmp.lt.s32.totalorder %s16_s10, %s16_s10 }
   0xa   :  { %p120_p3 = scmp.ne.s32.totalorder %s16_s10, %s119_s18  ;;  %p125_p5 = scmp.lt.s32.totalorder %s119_s18, %s119_s18 }
   0xc   :  { %p126_p6 = por %p125_p5, %p124_p4 }
   0xe   :  { %p127_p7 = pnand %p126_p6, %p120_p3 }
  0x10   :  { %130 = shalt.err (!%p127_p7)
}
  0x11   :  { %s182_s19 = smov 128   ;;  %s183_s20 = smov 8  }
  0x12   :  { %21 = dma.hbm_to_vmem [thread:$0]  %s237_s0, 256, %s16_s10, [#allocation3], %s182_s19, %s182_s19, %s183_s20  }
  0x13   :  { %s184_s23 = smov [#allocation5]   ;;  %s131_s27 = scalar_lea.hbm %s238_s1, 256 }
  0x14   :  { %s27_s24 = sshll.u32 %s184_s23, 4  ;;  %p132_p8 = scmp.ne.s32.totalorder %s238_s1, %s131_s27  ;;  %s28_s24 = int_to_ptr.vmem [resolvable:$true] %s27_s24 }
  0x15   :  { %p135_p9 = scmp.lt.u32.totalorder %s131_s27, %s238_s1 }
  0x17   :  { %p137_p10 = pnand %p135_p9, %p132_p8 }
  0x19   :  { %140 = shalt.err (!%p137_p10)
}
  0x1a   :  { %s141_s4 = scalar_lea.vmem %s28_s24, 256  ;;  %p146_p12 = scmp.lt.s32.totalorder %s28_s24, %s28_s24 }
  0x1b   :  { %p142_p11 = scmp.ne.s32.totalorder %s28_s24, %s141_s4  ;;  %p147_p13 = scmp.lt.s32.totalorder %s141_s4, %s141_s4 }
  0x1d   :  { %p148_p0 = por %p147_p13, %p146_p12 }
  0x1f   :  { %p149_p1 = pnand %p148_p0, %p142_p11 }
  0x21   :  { %152 = shalt.err (!%p149_p1)
}
  0x22   :  { %33 = dma.hbm_to_vmem [thread:$0]  %s238_s1, 256, %s28_s24, [#allocation6], %s182_s19, %s182_s19, %s183_s20  }
  0x23   :  { %175 = dma.done.wait [#allocation3], 256  }
  0x24   :  { %176 = vsyncadd [#allocation3], 4294967040 }
  0x25   :  { %177 = dma.done.wait [#allocation6], 256  }
  0x26   :  { %178 = vsyncadd [#allocation6], 4294967040  ;;  %v42_v0 = vld [vmem:[#allocation5] sm:$0xff]  ;;  %v43_v1 = vld [vmem:[#allocation5 + $0x8] sm:$0xff]  ;;  %s185_s1 = smov [#allocation7]  }
  0x27   :  { %44 = vadd.xlane.f32.xlu0 %v42_v0  ;;  %v40_v6 = vld [vmem:[#allocation2] sm:$0xff]  ;;  %v41_v7 = vld [vmem:[#allocation2 + $0x8] sm:$0xff]  ;;  %s82_s6 = sshll.u32 %s185_s1, 4  ;;  %s83_s6 = int_to_ptr.vmem [resolvable:$true] %s82_s6 }
  0x28   :  { %v54_v8 = vmul.f32 1.442695, %v40_v6  ;;  %v56_v10 = vmul.f32 1.442695, %v41_v7  ;;  %s153_s7 = scalar_lea.vmem %s83_s6, 128  ;;  %p158_p3 = scmp.lt.s32.totalorder %s83_s6, %s83_s6 }
  0x29   :  { %p154_p2 = scmp.ne.s32.totalorder %s83_s6, %s153_s7  ;;  %p159_p4 = scmp.lt.s32.totalorder %s153_s7, %s153_s7 }
  0x2b   :  { %46 = vadd.xlane.f32.xlu0 %v43_v1  ;;  %p160_p5 = por %p159_p4, %p158_p3 }
  0x2d   :  { %p161_p6 = pnand %p160_p5, %p154_p2 }
  0xb4   :  { %v45_v2 = vpop.xlane.xlu0 %44 }
  0xb5   :  { %v48_v3 = vadd.f32 1e-08, %v45_v2 }
  0xb7   :  { %97 = vrcp.f32 %v48_v3 }
  0xb8   :  { %v47_v4 = vpop.xlane.xlu0 %46 }
  0xb9   :  { %v49_v5 = vadd.f32 1e-08, %v47_v4 }
  0xbb   :  { %99 = vrcp.f32 %v49_v5 }
  0xbc   :  { %101 = vpow2.f32 %v54_v8 }
  0xbd   :  { %103 = vpow2.f32 %v56_v10 }
  0xc1   :  { %v98_v9 = vpop.eup %97 }
  0xc2   :  { %v52_v11 = vmul.f32 %v98_v9, %v42_v0 }
  0xc4   :  { %v58_v12 = vadd.f32 1e-08, %v52_v11 }
  0xc5   :  { %v100_v13 = vpop.eup %99 }
  0xc6   :  { %v53_v14 = vmul.f32 %v100_v13, %v43_v1  ;;  %105 = vlog2.f32 %v58_v12  ;;  %v102_v16 = vpop.eup %101 }
  0xc7   :  { %v104_v17 = vpop.eup %103  ;;  %v68_v21 = vsub.f32 1.0, %v102_v16 }
  0xc8   :  { %v59_v15 = vadd.f32 1e-08, %v53_v14  ;;  %v69_v22 = vsub.f32 1.0, %v104_v17 }
  0xc9   :  { %v70_v27 = vmul.f32 %v68_v21, %v68_v21 }
  0xca   :  { %107 = vlog2.f32 %v59_v15  ;;  %v71_v28 = vmul.f32 %v69_v22, %v69_v22 }
  0xd0   :  { %v106_v18 = vpop.eup %105 }
  0xd1   :  { %v61_v19 = vmul.f32 0.6931472, %v106_v18 }
  0xd3   :  { %v64_v20 = vsub.f32 %v61_v19, %v40_v6 }
  0xd4   :  { %v108_v23 = vpop.eup %107 }
  0xd5   :  { %v63_v24 = vmul.f32 0.6931472, %v108_v23  ;;  %v66_v26 = vmul.f32 %v64_v20, %v52_v11 }
  0xd7   :  { %v65_v25 = vsub.f32 %v63_v24, %v41_v7  ;;  %v72_v30 = vmul.f32 %v70_v27, %v66_v26 }
  0xd9   :  { %v67_v29 = vmul.f32 %v65_v25, %v53_v14 }
  0xdb   :  { %v73_v31 = vmul.f32 %v71_v28, %v67_v29 }
  0xdd   :  { %v74_v32 = vadd.f32 %v73_v31, %v72_v30 }
  0xdf   :  { %75 = vst [vmem:[#allocation7] sm:$0xff] %v74_v32 }
  0xe0   :  { %164 = shalt.err (!%p161_p6)
}
  0xe1   :  { %s165_s10 = scalar_lea.hbm %s239_s2, 128 }
  0xe2   :  { %p166_p7 = scmp.ne.s32.totalorder %s239_s2, %s165_s10  ;;  %p169_p8 = scmp.lt.u32.totalorder %s165_s10, %s239_s2 }
  0xe4   :  { %p171_p9 = pnand %p169_p8, %p166_p7 }
  0xe6   :  { %174 = shalt.err (!%p171_p9)
}
  0xe7   :  { %85 = dma.vmem_to_hbm [thread:$0]  %s83_s6, 128, %s239_s2, [#allocation4]  }
  0xe8   :  { %179 = dma.done.wait [#allocation4], 128  }
  0xe9   :  { %180 = vsyncadd [#allocation4], 4294967168 }
  0xea   :  { %89 = vsyncpa [#allocation3], 1 }
  0xeb   :  { %90 = vsyncpa [#allocation6], 1 }
  0xec   :  { %91 = vsyncpa [#allocation4], 1 }

</bundles_post_ra>
